<compile_context>
chip_gen: v7x
topology: tpu7x:2x2x1
jax: 0.10.0
libtpu: 0.0.40
codegen_flags: <defaults>
</compile_context>

<pallas_src>
import jax
import jax.numpy as jnp
from jax.experimental import pallas as pl
from jax.experimental.pallas import tpu as pltpu


def _round_up(x, n):
    return (x + n - 1) // n * n


def _pad_to(a, shape):
    pads = [(0, t - s) for s, t in zip(a.shape, shape)]
    if all(p == (0, 0) for p in pads):
        return a
    return jnp.pad(a, pads)


def _make_kernel(m, s, n_classes, tile_c, matmul_dtype):
    # Plain Python floats -> baked into the trace as literals (no captured
    # device constants, which pallas_call rejects).
    neg = -1e30          # finite "-inf": exp() underflows to 0, no inf-inf NaNs
    sm = float(s) * float(m)
    sf = float(s)

    def kernel(x_ref, w_ref, winv_ref, lb_ref, loss_ref,
               m_sc, l_sc, t_sc, xinv_sc):
        ci = pl.program_id(1)

        # ---- per-B-tile init (runs once per batch tile, at the first class tile)
        @pl.when(ci == 0)
        def _init():
            xf = x_ref[...].astype(jnp.float32)
            xinv_sc[...] = 1.0 / jnp.maximum(
                jnp.sqrt(jnp.sum(xf * xf, axis=1, keepdims=True)), 1e-12)
            m_sc[...] = jnp.full_like(m_sc, neg)
            l_sc[...] = jnp.zeros_like(l_sc)
            t_sc[...] = jnp.zeros_like(t_sc)

        # ---- cosine-similarity tile on the MXU (f32 accumulation).
        # (x @ W) * (1/||x||) * (1/||W_col||) == (x/||x||) @ (W/||W_col||)
        raw = jnp.dot(x_ref[...].astype(matmul_dtype),
                      w_ref[...].astype(matmul_dtype),
                      preferred_element_type=jnp.float32)
        costh = raw * xinv_sc[...] * winv_ref[...]          # (TB, TC) f32

        tb, tc = costh.shape
        gcol = ci * tile_c + jax.lax.broadcasted_iota(jnp.int32, (tb, tc), 1)
        is_tgt = gcol == lb_ref[...]                        # compare/select, no f32 one-hot

        logits = sf * costh - jnp.where(is_tgt, sm, 0.0)
        logits = jnp.where(gcol < n_classes, logits, neg)   # mask padded classes

        # ---- online logsumexp over class tiles
        m_prev = m_sc[...]
        m_new = jnp.maximum(m_prev, jnp.max(logits, axis=1, keepdims=True))
        alpha = jnp.exp(m_prev - m_new)
        p = jnp.exp(logits - m_new)
        l_sc[...] = alpha * l_sc[...] + jnp.sum(p, axis=1, keepdims=True)
        t_sc[...] = t_sc[...] + jnp.sum(jnp.where(is_tgt, logits, 0.0),
                                        axis=1, keepdims=True)
        m_sc[...] = m_new

        # ---- finalize: per-sample cross-entropy = lse - target_logit
        @pl.when(ci == pl.num_programs(1) - 1)
        def _finalize():
            loss_ref[...] = m_sc[...] + jnp.log(l_sc[...]) - t_sc[...]

    return kernel


def amsoftmax_loss(x, W, lb, *, m=0.3, s=15.0,
                   matmul_dtype=jnp.float32, block_b=128, block_c=512):
    """AMSoftmax loss (mean over batch).

    x:  (B, in_feats) float
    W:  (in_feats, n_classes) float
    lb: (B,) int labels
    matmul_dtype: jnp.float32 (exact) or jnp.bfloat16 (v6e/v7x MXU fast path).
    """
    B, D = x.shape
    D2, C = W.shape
    assert D == D2 and lb.shape[0] == B

    # Hoisted out of the kernel: 1/||W_col||, O(D*C), reused every training step.
    w_inv = 1.0 / jnp.maximum(
        jnp.sqrt(jnp.sum(W.astype(jnp.float32) ** 2, axis=0, keepdims=True)), 1e-12)

    # Tile sizes: lane-aligned class tiles (multiple of 128), sublane-aligned
    # batch tiles (multiple of 8). Sized well within v7x's 64 MiB VMEM.
    tb = min(_round_up(block_b, 8), _round_up(B, 8))
    tc = min(_round_up(block_c, 128), _round_up(C, 128))
    Bp = _round_up(B, tb)
    Cp = _round_up(C, tc)
    nb, nc = Bp // tb, Cp // tc

    xp = _pad_to(x, (Bp, D))
    Wp = _pad_to(W, (D, Cp))
    winvp = _pad_to(w_inv, (1, Cp))
    # Labels kept as a tiny (TB, 1) int32 VMEM block (needed as a vector for the
    # lane-wise compare); resident across the class loop like x.
    lbp = _pad_to(lb.astype(jnp.int32).reshape(B, 1), (Bp, 1))

    grid_spec = pltpu.PrefetchScalarGridSpec(
        num_scalar_prefetch=0,
        grid=(nb, nc),
        in_specs=[
            pl.BlockSpec((tb, D), lambda bi, ci: (bi, 0)),   # x: resident over class loop
            pl.BlockSpec((D, tc), lambda bi, ci: (0, ci)),   # W: streams over class tiles
            pl.BlockSpec((1, tc), lambda bi, ci: (0, ci)),   # 1/||W_col||
            pl.BlockSpec((tb, 1), lambda bi, ci: (bi, 0)),   # labels
        ],
        out_specs=pl.BlockSpec((tb, 1), lambda bi, ci: (bi, 0)),
        scratch_shapes=[
            pltpu.VMEM((tb, 1), jnp.float32),   # running max
            pltpu.VMEM((tb, 1), jnp.float32),   # running exp-sum
            pltpu.VMEM((tb, 1), jnp.float32),   # target logit accumulator
            pltpu.VMEM((tb, 1), jnp.float32),   # 1/||x_row||
        ],
    )

    per_sample = pl.pallas_call(
        _make_kernel(float(m), float(s), C, tc, matmul_dtype),
        out_shape=jax.ShapeDtypeStruct((Bp, 1), jnp.float32),
        grid_spec=grid_spec,
        compiler_params=pltpu.CompilerParams(
            dimension_semantics=("parallel", "arbitrary"),  # batch parallel (2 TCs on v7x)
            vmem_limit_bytes=32 * 1024 * 1024,
        ),
    )(xp, Wp, winvp, lbp)

    # Mean reduction over the valid (un-padded) rows, done in the wrapper so the
    # kernel's batch axis stays parallel.
    return jnp.mean(per_sample[:B, 0])


def _reference_loss(x, W, lb, m=0.3, s=15.0):
    xn = x / jnp.maximum(jnp.linalg.norm(x, axis=1, keepdims=True), 1e-12)
    wn = W / jnp.maximum(jnp.linalg.norm(W, axis=0, keepdims=True), 1e-12)
    costh = xn @ wn
    onehot = jax.nn.one_hot(lb, W.shape[1], dtype=jnp.float32)
    logits = s * (costh - m * onehot)
    logp = jax.nn.log_softmax(logits, axis=1)
    return -jnp.mean(jnp.sum(onehot * logp, axis=1))


if __name__ == "__main__":
    m, s = 0.3, 15.0
    key = jax.random.PRNGKey(0)
    k1, k2 = jax.random.split(key)

    def make_case(k, B, D, C):
        kx, kw, kl = jax.random.split(k, 3)
        x = jax.random.normal(kx, (B, D), dtype=jnp.float32)
        std = (2.0 / (D + C)) ** 0.5  # xavier_normal_(gain=1)
        W = std * jax.random.normal(kw, (D, C), dtype=jnp.float32)
        lb = jax.random.randint(kl, (B,), 0, C, dtype=jnp.int32)
        return x, W, lb

    # Case 1: small single-tile shapes (module-scale defaults).
    x, W, lb = make_case(k1, 8, 32, 16)
    loss = amsoftmax_loss(x, W, lb, m=m, s=s)
    jax.block_until_ready(loss)
    ref = _reference_loss(x, W, lb, m=m, s=s)
    assert jnp.allclose(loss, ref, atol=1e-4, rtol=1e-4), (loss, ref)

    # Case 2: forces batch tiling, class tiling, padding and the online-lse path.
    x2, W2, lb2 = make_case(k2, 20, 48, 200)
    loss2 = amsoftmax_loss(x2, W2, lb2, m=m, s=s, block_b=8, block_c=128)
    jax.block_until_ready(loss2)
    ref2 = _reference_loss(x2, W2, lb2, m=m, s=s)
    assert jnp.allclose(loss2, ref2, atol=1e-4, rtol=1e-4), (loss2, ref2)

    # Case 3: bf16 MXU inputs, f32 accumulation (v6e/v7x fast path).
    loss3 = amsoftmax_loss(x2, W2, lb2, m=m, s=s, block_b=8, block_c=128,
                           matmul_dtype=jnp.bfloat16)
    jax.block_until_ready(loss3)
    assert jnp.allclose(loss3, ref2, atol=5e-2, rtol=5e-2), (loss3, ref2)

    print("KERNEL_OK")
</pallas_src>

<mosaic_0001>
module attributes {stable_mosaic.version = 11 : i64} {
  func.func @kernel(%arg0: i32, %arg1: i32, %arg2: memref<8x32xf32, #tpu.memory_space<vmem>>, %arg3: memref<32x128xf32, #tpu.memory_space<vmem>>, %arg4: memref<1x128xf32, #tpu.memory_space<vmem>>, %arg5: memref<8x1xi32, #tpu.memory_space<vmem>>, %arg6: memref<8x1xf32, #tpu.memory_space<vmem>>, %arg7: memref<8x1xf32, #tpu.memory_space<vmem>>, %arg8: memref<8x1xf32, #tpu.memory_space<vmem>>, %arg9: memref<8x1xf32, #tpu.memory_space<vmem>>, %arg10: memref<8x1xf32, #tpu.memory_space<vmem>>) attributes {dimension_semantics = [#tpu.dimension_semantics<parallel>, #tpu.dimension_semantics<arbitrary>], iteration_bounds = array<i64: 1, 1>, scalar_prefetch = 0 : i64, scratch_operands = 4 : i64, tpu.core_type = #tpu.core_type<tc>, window_params = [{transform_indices = @transform_0, window_bounds = array<i64: 8, 32>}, {transform_indices = @transform_1, window_bounds = array<i64: 32, 128>}, {transform_indices = @transform_2, window_bounds = array<i64: 1, 128>}, {transform_indices = @transform_3, window_bounds = array<i64: 8, 1>}, {transform_indices = @transform_4, window_bounds = array<i64: 8, 1>}]} {
    %c0_i32 = arith.constant 0 : i32
    %0 = arith.cmpi eq, %arg1, %c0_i32 : i32
    %1 = arith.extui %0 : i1 to i32
    %c0_i32_0 = arith.constant 0 : i32
    %2 = arith.cmpi ne, %1, %c0_i32_0 : i32
    scf.if %2 {
      %c0_32 = arith.constant 0 : index
      %c0_33 = arith.constant 0 : index
      %55 = vector.load %arg2[%c0_32, %c0_33] : memref<8x32xf32, #tpu.memory_space<vmem>>, vector<8x32xf32>
      %56 = arith.mulf %55, %55 : vector<8x32xf32>
      %cst_34 = arith.constant dense<0.000000e+00> : vector<8xf32>
      %57 = vector.multi_reduction <add>, %56, %cst_34 [1] : vector<8x32xf32> to vector<8xf32>
      %58 = vector.shape_cast %57 : vector<8xf32> to vector<8x1xf32>
      %59 = math.sqrt %58 : vector<8x1xf32>
      %cst_35 = arith.constant 9.99999996E-13 : f32
      %60 = vector.broadcast %cst_35 : f32 to vector<8x1xf32>
      %61 = arith.maximumf %59, %60 : vector<8x1xf32>
      %cst_36 = arith.constant 1.000000e+00 : f32
      %62 = vector.broadcast %cst_36 : f32 to vector<8x1xf32>
      %63 = arith.divf %62, %61 : vector<8x1xf32>
      %c0_37 = arith.constant 0 : index
      %c0_38 = arith.constant 0 : index
      %64 = vector.load %arg10[%c0_37, %c0_38] : memref<8x1xf32, #tpu.memory_space<vmem>>, vector<8x1xf32>
      tpu.vector_store %arg10[%c0_37, %c0_38], %63 {strides = array<i32>} : memref<8x1xf32, #tpu.memory_space<vmem>>, vector<8x1xf32>,
      %cst_39 = arith.constant -1.000000e+30 : f32
      %65 = vector.broadcast %cst_39 : f32 to vector<8x1xf32>
      %c0_40 = arith.constant 0 : index
      %c0_41 = arith.constant 0 : index
      %66 = vector.load %arg7[%c0_40, %c0_41] : memref<8x1xf32, #tpu.memory_space<vmem>>, vector<8x1xf32>
      tpu.vector_store %arg7[%c0_40, %c0_41], %65 {strides = array<i32>} : memref<8x1xf32, #tpu.memory_space<vmem>>, vector<8x1xf32>,
      %cst_42 = arith.constant 0.000000e+00 : f32
      %67 = vector.broadcast %cst_42 : f32 to vector<8x1xf32>
      %c0_43 = arith.constant 0 : index
      %c0_44 = arith.constant 0 : index
      %68 = vector.load %arg8[%c0_43, %c0_44] : memref<8x1xf32, #tpu.memory_space<vmem>>, vector<8x1xf32>
      tpu.vector_store %arg8[%c0_43, %c0_44], %67 {strides = array<i32>} : memref<8x1xf32, #tpu.memory_space<vmem>>, vector<8x1xf32>,
      %cst_45 = arith.constant 0.000000e+00 : f32
      %69 = vector.broadcast %cst_45 : f32 to vector<8x1xf32>
      %c0_46 = arith.constant 0 : index
      %c0_47 = arith.constant 0 : index
      %70 = vector.load %arg9[%c0_46, %c0_47] : memref<8x1xf32, #tpu.memory_space<vmem>>, vector<8x1xf32>
      tpu.vector_store %arg9[%c0_46, %c0_47], %69 {strides = array<i32>} : memref<8x1xf32, #tpu.memory_space<vmem>>, vector<8x1xf32>,
    } else {
    }
    %c0 = arith.constant 0 : index
    %c0_1 = arith.constant 0 : index
    %3 = vector.load %arg2[%c0, %c0_1] : memref<8x32xf32, #tpu.memory_space<vmem>>, vector<8x32xf32>
    %c0_2 = arith.constant 0 : index
    %c0_3 = arith.constant 0 : index
    %4 = vector.load %arg3[%c0_2, %c0_3] : memref<32x128xf32, #tpu.memory_space<vmem>>, vector<32x128xf32>
    %cst = arith.constant dense<0.000000e+00> : vector<8x128xf32>
    %5 = tpu.matmul %3, %4, %cst {dimension_numbers = #tpu.dot_dimension_numbers<[1], [0], [0], [1], [0, 0, 1, 1], [], []>} : vector<8x32xf32>, vector<32x128xf32>, vector<8x128xf32> -> vector<8x128xf32>
    %c0_4 = arith.constant 0 : index
    %c0_5 = arith.constant 0 : index
    %6 = vector.load %arg10[%c0_4, %c0_5] : memref<8x1xf32, #tpu.memory_space<vmem>>, vector<8x1xf32>
    %7 = vector.broadcast %6 : vector<8x1xf32> to vector<8x128xf32>
    %8 = arith.mulf %5, %7 : vector<8x128xf32>
    %c0_6 = arith.constant 0 : index
    %c0_7 = arith.constant 0 : index
    %9 = vector.load %arg4[%c0_6, %c0_7] : memref<1x128xf32, #tpu.memory_space<vmem>>, vector<1x128xf32>
    %10 = vector.broadcast %9 : vector<1x128xf32> to vector<8x128xf32>
    %11 = arith.mulf %8, %10 : vector<8x128xf32>
    %c128_i32 = arith.constant 128 : i32
    %12 = arith.muli %arg1, %c128_i32 : i32
    %13 = tpu.iota {dimensions = array<i32: 1>} : vector<8x128xi32>
    %14 = vector.broadcast %12 : i32 to vector<8x128xi32>
    %15 = arith.addi %14, %13 : vector<8x128xi32>
    %c0_8 = arith.constant 0 : index
    %c0_9 = arith.constant 0 : index
    %16 = vector.load %arg5[%c0_8, %c0_9] : memref<8x1xi32, #tpu.memory_space<vmem>>, vector<8x1xi32>
    %17 = vector.broadcast %16 : vector<8x1xi32> to vector<8x128xi32>
    %18 = arith.cmpi eq, %15, %17 : vector<8x128xi32>
    %cst_10 = arith.constant 1.500000e+01 : f32
    %19 = vector.broadcast %cst_10 : f32 to vector<8x128xf32>
    %20 = arith.mulf %19, %11 : vector<8x128xf32>
    %cst_11 = arith.constant 4.500000e+00 : f32
    %cst_12 = arith.constant 0.000000e+00 : f32
    %21 = vector.broadcast %cst_11 : f32 to vector<8x128xf32>
    %22 = vector.broadcast %cst_12 : f32 to vector<8x128xf32>
    %23 = arith.select %18, %21, %22 : vector<8x128xi1>, vector<8x128xf32>
    %24 = arith.subf %20, %23 : vector<8x128xf32>
    %c16_i32 = arith.constant 16 : i32
    %25 = vector.broadcast %c16_i32 : i32 to vector<8x128xi32>
    %26 = arith.cmpi slt, %15, %25 : vector<8x128xi32>
    %cst_13 = arith.constant -1.000000e+30 : f32
    %27 = vector.broadcast %cst_13 : f32 to vector<8x128xf32>
    %28 = arith.select %26, %24, %27 : vector<8x128xi1>, vector<8x128xf32>
    %c0_14 = arith.constant 0 : index
    %c0_15 = arith.constant 0 : index
    %29 = vector.load %arg7[%c0_14, %c0_15] : memref<8x1xf32, #tpu.memory_space<vmem>>, vector<8x1xf32>
    %cst_16 = arith.constant dense<0xFF800000> : vector<8xf32>
    %30 = vector.multi_reduction <maximumf>, %28, %cst_16 [1] : vector<8x128xf32> to vector<8xf32>
    %31 = vector.shape_cast %30 : vector<8xf32> to vector<8x1xf32>
    %32 = arith.maximumf %29, %31 : vector<8x1xf32>
    %33 = arith.subf %29, %32 : vector<8x1xf32>
    %34 = math.exp %33 : vector<8x1xf32>
    %35 = vector.broadcast %32 : vector<8x1xf32> to vector<8x128xf32>
    %36 = arith.subf %28, %35 : vector<8x128xf32>
    %37 = math.exp %36 : vector<8x128xf32>
    %c0_17 = arith.constant 0 : index
    %c0_18 = arith.constant 0 : index
    %38 = vector.load %arg8[%c0_17, %c0_18] : memref<8x1xf32, #tpu.memory_space<vmem>>, vector<8x1xf32>
    %39 = arith.mulf %34, %38 : vector<8x1xf32>
    %cst_19 = arith.constant dense<0.000000e+00> : vector<8xf32>
    %40 = vector.multi_reduction <add>, %37, %cst_19 [1] : vector<8x128xf32> to vector<8xf32>
    %41 = vector.shape_cast %40 : vector<8xf32> to vector<8x1xf32>
    %42 = arith.addf %39, %41 : vector<8x1xf32>
    %c0_20 = arith.constant 0 : index
    %c0_21 = arith.constant 0 : index
    %43 = vector.load %arg8[%c0_20, %c0_21] : memref<8x1xf32, #tpu.memory_space<vmem>>, vector<8x1xf32>
    tpu.vector_store %arg8[%c0_20, %c0_21], %42 {strides = array<i32>} : memref<8x1xf32, #tpu.memory_space<vmem>>, vector<8x1xf32>,
    %c0_22 = arith.constant 0 : index
    %c0_23 = arith.constant 0 : index
    %44 = vector.load %arg9[%c0_22, %c0_23] : memref<8x1xf32, #tpu.memory_space<vmem>>, vector<8x1xf32>
    %cst_24 = arith.constant 0.000000e+00 : f32
    %45 = vector.broadcast %cst_24 : f32 to vector<8x128xf32>
    %46 = arith.select %18, %28, %45 : vector<8x128xi1>, vector<8x128xf32>
    %cst_25 = arith.constant dense<0.000000e+00> : vector<8xf32>
    %47 = vector.multi_reduction <add>, %46, %cst_25 [1] : vector<8x128xf32> to vector<8xf32>
    %48 = vector.shape_cast %47 : vector<8xf32> to vector<8x1xf32>
    %49 = arith.addf %44, %48 : vector<8x1xf32>
    %c0_26 = arith.constant 0 : index
    %c0_27 = arith.constant 0 : index
    %50 = vector.load %arg9[%c0_26, %c0_27] : memref<8x1xf32, #tpu.memory_space<vmem>>, vector<8x1xf32>
    tpu.vector_store %arg9[%c0_26, %c0_27], %49 {strides = array<i32>} : memref<8x1xf32, #tpu.memory_space<vmem>>, vector<8x1xf32>,
    %c0_28 = arith.constant 0 : index
    %c0_29 = arith.constant 0 : index
    %51 = vector.load %arg7[%c0_28, %c0_29] : memref<8x1xf32, #tpu.memory_space<vmem>>, vector<8x1xf32>
    tpu.vector_store %arg7[%c0_28, %c0_29], %32 {strides = array<i32>} : memref<8x1xf32, #tpu.memory_space<vmem>>, vector<8x1xf32>,
    %c0_i32_30 = arith.constant 0 : i32
    %52 = arith.cmpi eq, %arg1, %c0_i32_30 : i32
    %53 = arith.extui %52 : i1 to i32
    %c0_i32_31 = arith.constant 0 : i32
    %54 = arith.cmpi ne, %53, %c0_i32_31 : i32
    scf.if %54 {
      %c0_32 = arith.constant 0 : index
      %c0_33 = arith.constant 0 : index
      %55 = vector.load %arg7[%c0_32, %c0_33] : memref<8x1xf32, #tpu.memory_space<vmem>>, vector<8x1xf32>
      %c0_34 = arith.constant 0 : index
      %c0_35 = arith.constant 0 : index
      %56 = vector.load %arg8[%c0_34, %c0_35] : memref<8x1xf32, #tpu.memory_space<vmem>>, vector<8x1xf32>
      %57 = math.log %56 : vector<8x1xf32>
      %58 = arith.addf %55, %57 : vector<8x1xf32>
      %c0_36 = arith.constant 0 : index
      %c0_37 = arith.constant 0 : index
      %59 = vector.load %arg9[%c0_36, %c0_37] : memref<8x1xf32, #tpu.memory_space<vmem>>, vector<8x1xf32>
      %60 = arith.subf %58, %59 : vector<8x1xf32>
      %c0_38 = arith.constant 0 : index
      %c0_39 = arith.constant 0 : index
      %61 = vector.load %arg6[%c0_38, %c0_39] : memref<8x1xf32, #tpu.memory_space<vmem>>, vector<8x1xf32>
      tpu.vector_store %arg6[%c0_38, %c0_39], %60 {strides = array<i32>} : memref<8x1xf32, #tpu.memory_space<vmem>>, vector<8x1xf32>,
    } else {
    }
    return
  }
  func.func @transform_0(%arg0: i32, %arg1: i32) -> (i32, i32) {
    %c0_i32 = arith.constant 0 : i32
    %c0_i32_0 = arith.constant 0 : i32
    return %arg0, %c0_i32 : i32, i32
  }
  func.func @transform_1(%arg0: i32, %arg1: i32) -> (i32, i32) {
    %c0_i32 = arith.constant 0 : i32
    %c0_i32_0 = arith.constant 0 : i32
    return %c0_i32, %arg1 : i32, i32
  }
  func.func @transform_2(%arg0: i32, %arg1: i32) -> (i32, i32) {
    %c0_i32 = arith.constant 0 : i32
    %c0_i32_0 = arith.constant 0 : i32
    return %c0_i32, %arg1 : i32, i32
  }
  func.func @transform_3(%arg0: i32, %arg1: i32) -> (i32, i32) {
    %c0_i32 = arith.constant 0 : i32
    %c0_i32_0 = arith.constant 0 : i32
    return %arg0, %c0_i32 : i32, i32
  }
  func.func @transform_4(%arg0: i32, %arg1: i32) -> (i32, i32) {
    %c0_i32 = arith.constant 0 : i32
    %c0_i32_0 = arith.constant 0 : i32
    return %arg0, %c0_i32 : i32, i32
  }
}

</mosaic_0001>

<bundles_post_ra>
// kernel: tpu_custom_call.1
= control target key start
LH: loop header
LB: loop body
LE: loop exit
PB: predicated region body
PF: predicated region fallthrough
CT: control target
= control target key end

     0   :  { %9 = vsyncpa [#allocation7], 0  ;;  %s278_s15 = smov [#allocation6]   ;;  %s343_s0 = inlined_call_operand.vmem [shape: f32[8,32], index: 0, kind: input, shape index: {}]   ;;  %s344_s1 = inlined_call_operand.hbm [shape: f32[32,128], index: 1, kind: input, shape index: {}]   ;;  %s345_s2 = inlined_call_operand.vmem [shape: f32[1,128], index: 2, kind: input, shape index: {}]   ;;  %s346_s3 = inlined_call_operand.vmem [shape: s32[8,1], index: 3, kind: input, shape index: {}]   ;;  %s347_s4 = inlined_call_operand.vmem [shape: f32[8,1], index: 4, kind: output, shape index: {}]  }
   0x1   :  { %s17_s16 = sshll.u32 %s278_s15, 4  ;;  %s254_s19 = scalar_lea.hbm %s344_s1, 512  ;;  %s18_s16 = int_to_ptr.vmem [resolvable:$true] %s17_s16 }
   0x2   :  { %p255_p0 = scmp.ne.s32.totalorder %s344_s1, %s254_s19  ;;  %p258_p1 = scmp.lt.u32.totalorder %s254_s19, %s344_s1 }
   0x4   :  { %p260_p2 = pnand %p258_p1, %p255_p0 }
   0x6   :  { %263 = shalt.err (!%p260_p2)
}
   0x7   :  { %s264_s24 = scalar_lea.vmem %s18_s16, 512  ;;  %p269_p4 = scmp.lt.s32.totalorder %s18_s16, %s18_s16 }
   0x8   :  { %p265_p3 = scmp.ne.s32.totalorder %s18_s16, %s264_s24  ;;  %p270_p5 = scmp.lt.s32.totalorder %s264_s24, %s264_s24 }
   0xa   :  { %p271_p6 = por %p270_p5, %p269_p4 }
   0xc   :  { %p272_p7 = pnand %p271_p6, %p265_p3 }
   0xe   :  { %275 = shalt.err (!%p272_p7)
}
   0xf   :  { %s279_s25 = smov 128   ;;  %s280_s26 = smov 8  }
  0x10   :  { %23 = dma.hbm_to_vmem [thread:$0]  %s344_s1, 512, %s18_s16, [#allocation7], %s279_s25, %s279_s25, %s280_s26  }
  0x11   :  { %276 = dma.done.wait [#allocation7], 512  }
  0x12   :  { %277 = vsyncadd [#allocation7], 4294966784  ;;  %vm51_vm0 = vcmask 7168   ;;  %v281_v0 = vmov 0.0|0.0   ;;  %v282_v1 = vmov 0.0   ;;  %vm283_vm1 = vmmov 0  }
  0x13   :  { %228 = vmatprep.subr.bf16.mxu0 %v281_v0  ;;  %54 = vst.msk [vmem:[#allocation3] sm:$0xff] %vm51_vm0, %v282_v1  ;;  %55 = vst.msk [vmem:[#allocation4] sm:$0xff] %vm51_vm0, %v282_v1  ;;  %225 = vmatprep.mubr.msk.f32.mxu0 %vm283_vm1, %v282_v1  ;;  %v35_v2 = vld [vmem:[%s343_s0] sm:$0xff]  ;;  %vm37_vm2 = vcmask 261120   ;;  %v58_v4 = vld [vmem:[#allocation6 + $0x8] sm:$0xff]  ;;  %v284_v11 = vmov 0   ;;  %v151_v25 = vlaneseq }
  0x14   :  { %v57_v3 = vld [vmem:[#allocation6] sm:$0xff]  ;;  %v36_v5 = vmul.f32 %v35_v2, %v35_v2  ;;  %v59_v7 = vld [vmem:[#allocation6 + $0x10] sm:$0xff]  ;;  %v60_v8 = vld [vmem:[#allocation6 + $0x18] sm:$0xff]  ;;  %242 = vset.pattern.permute.xlu0 %v284_v11  ;;  %243 = vset.pattern.permute.xlu1 %v284_v11  ;;  %v285_v22 = vmov -1e+30  }
  0x15   :  { %v229_v6 = vpack.c.bf16 %v58_v4, %v57_v3  ;;  %v232_v10 = vpack.c.bf16 %v60_v8, %v59_v7  ;;  %v155_v12 = vld [vmem:[%s346_s3] sm:$0xff]  ;;  %53 = vst.msk [vmem:[#allocation2] sm:$0xff] %vm51_vm0, %v285_v22  ;;  %v152_v26 = vand.u32 127, %v151_v25 }
  0x16   :  { %v38_v9 = vsel %vm37_vm2, %v36_v5, 0.0  ;;  %157 = vperm.xlu1 %243, %v155_v12   ;;  %v211_v28 = vld [vmem:[%s345_s2] ss:$0 sm:$0xff] }
  0x17   :  { %230 = vmatpush3.bf16.msra.mxu0 %v229_v6  ;;  %39 = vadd.xlane.f32.xlu0 %v38_v9  ;;  %vm163_vm6 = vcmp.lt.s32.totalorder %v152_v26, 16 }
  0x18   :  { %231 = vmatprep.subr.bf16.mxu0 %v281_v0 }
  0x1a   :  { %v187_v45 = vld [vmem:[#allocation4] sm:$0xff]  ;;  %v180_v50 = vld [vmem:[#allocation3] sm:$0xff] }
  0x1b   :  { %233 = vmatpush3.bf16.msra.mxu0 %v232_v10 }
  0x1c   :  { %v165_v36 = vld [vmem:[#allocation2] sm:$0xff] }
  0x1e   :  { %226 = vmatmul.mubr.msk.f32.vlgmr.msra.gmra.mrb[0].mxu0 %vm37_vm2, %v35_v2 }
  0x95   :  { %v158_v27 = vpop.permute.xlu1 %157 }
  0x96   :  { %vm159_vm5 = vcmp.eq.s32.totalorder %v152_v26, %v158_v27 }
  0x97   :  { %v161_v32 = vsel %vm159_vm5, 4.5, %v282_v1 }
  0xa4   :  { %v40_v13 = vpop.xlane.xlu0 %39 }
  0xa5   :  { %244 = vrsqrt.f32 %v40_v13  ;;  %vm43_vm3 = vcmp.eq.f32.partialorder %v40_v13, inf  ;;  %v46_v16 = vand.u32 2147483648, %v40_v13  ;;  %vm45_vm4 = vcmp.eq.f32.partialorder %v40_v13, 0.0 }
  0xaf   :  { %v245_v14 = vpop.eup %244 }
  0xb0   :  { %v42_v15 = vmul.f32 %v245_v14, %v40_v13 }
  0xb2   :  { %v44_v17 = vsel %vm43_vm3, %v40_v13, %v42_v15 }
  0xb3   :  { %v47_v18 = vsel %vm45_vm4, %v46_v16, %v44_v17 }
  0xb4   :  { %v48_v19 = vmax.f32 %v47_v18, 1e-12 }
  0xb6   :  { %246 = vrcp.f32 %v48_v19 }
  0xc0   :  { %v247_v20 = vpop.eup %246 }
  0xc1   :  { %52 = vst.msk [vmem:[#allocation5] sm:$0xff] %vm51_vm0, %v247_v20 }
  0xc8   :  { %v135_v21 = vld [vmem:[#allocation5] sm:$0xff] }
  0xc9   :  { %138 = vperm.xlu0 %242, %v135_v21  }
  0xf1   :  { %v131_v23 = vpop.f32.mrb[0].mxu0 }
  0xf2   :  { %v227_v24 = vpop.f32.mrb[1].mxu0 }
 0x148   :  { %v139_v29 = vpop.permute.xlu0 %138 }
 0x149   :  { %v141_v30 = vmul.f32 %v139_v29, %v131_v23 }
 0x14b   :  { %v149_v31 = vmul.f32 %v211_v28, %v141_v30 }
 0x14d   :  { %v160_v33 = vmul.f32 15.0, %v149_v31 }
 0x14f   :  { %v162_v34 = vsub.f32 %v160_v33, %v161_v32 }
 0x151   :  { %v164_v35 = vsel %vm163_vm6, %v162_v34, -1e+30 }
 0x152   :  { %166 = vmax.xlane.f32.xlu1 %v164_v35  ;;  %v188_v40 = vsel %vm159_vm5, %v164_v35, 0.0 }
 0x1df   :  { %v167_v37 = vpop.xlane.xlu1 %166 }
 0x1e0   :  { %v168_v38 = vmax.f32 %v165_v36, %v167_v37 }
 0x1e2   :  { %v169_v39 = vsub.f32 %v165_v36, %v168_v38  ;;  %193 = vst.msk [vmem:[#allocation2] sm:$0xff] %vm51_vm0, %v168_v38  ;;  %174 = vperm.xlu1 %243, %v168_v38  }
 0x1e4   :  { %v170_v48 = vmul.f32 1.442695, %v169_v39 }
 0x1e9   :  { %v197_v57 = vld [vmem:[#allocation2] sm:$0xff] }
 0x206   :  { %189 = vadd.xlane.f32.xlu1 %v188_v40 }
 0x261   :  { %v175_v41 = vpop.permute.xlu1 %174 }
 0x262   :  { %v177_v42 = vsub.f32 %v164_v35, %v175_v41 }
 0x264   :  { %v178_v43 = vmul.f32 1.442695, %v177_v42 }
 0x266   :  { %248 = vpow2.f32 %v178_v43 }
 0x267   :  { %250 = vpow2.f32 %v170_v48 }
 0x270   :  { %v249_v44 = vpop.eup %248 }
 0x271   :  { %182 = vadd.xlane.f32.xlu0 %v249_v44  ;;  %v251_v49 = vpop.eup %250 }
 0x272   :  { %v181_v51 = vmul.f32 %v251_v49, %v180_v50 }
 0x293   :  { %v190_v46 = vpop.xlane.xlu1 %189 }
 0x294   :  { %v191_v47 = vadd.f32 %v190_v46, %v187_v45 }
 0x296   :  { %192 = vst.msk [vmem:[#allocation4] sm:$0xff] %vm51_vm0, %v191_v47 }
 0x29d   :  { %v202_v59 = vld [vmem:[#allocation4] sm:$0xff] }
 0x2fe   :  { %v183_v52 = vpop.xlane.xlu0 %182 }
 0x2ff   :  { %v184_v53 = vadd.f32 %v183_v52, %v181_v51 }
 0x301   :  { %186 = vst.msk [vmem:[#allocation3] sm:$0xff] %vm51_vm0, %v184_v53 }
 0x308   :  { %v198_v54 = vld [vmem:[#allocation3] sm:$0xff] }
 0x309   :  { %252 = vlog2.f32 %v198_v54 }
 0x313   :  { %v253_v55 = vpop.eup %252 }
 0x314   :  { %v200_v56 = vmul.f32 0.6931472, %v253_v55 }
 0x316   :  { %v201_v58 = vadd.f32 %v200_v56, %v197_v57 }
 0x318   :  { %v203_v60 = vsub.f32 %v201_v58, %v202_v59 }
 0x31a   :  { %204 = vst.msk [vmem:[%s347_s4] sm:$0xff] %vm51_vm0, %v203_v60 }
 0x31b   :  { %209 = vsyncpa [#allocation7], 1 }

</bundles_post_ra>
